<compile_context>
chip_gen: v5e
topology: v5e:2x2
jax: 0.10.0
libtpu: 0.0.40
codegen_flags: <defaults>
</compile_context>

<pallas_src>
import jax
import jax.numpy as jnp
from jax.experimental import pallas as pl
from jax.experimental.pallas import tpu as pltpu


def _objective_kernel(*refs):
    # refs = (rep_ref, leaf_ref_0, ..., leaf_ref_{L-1}, out_ref)
    # rep_ref / leaf_ref_k : [TB, D] float32
    # out_ref              : [1, 1, TB] float32 (lane-dense, batch on lanes)
    rep_ref = refs[0]
    leaf_refs = refs[1:-1]
    out_ref = refs[-1]

    # Composition is pure addition: compose(expr) == sum over leaf embeddings.
    composed = leaf_refs[0][...]
    for r in leaf_refs[1:]:
        composed = composed + r[...]
    rep = rep_ref[...]

    # F.normalize eps = 1e-12  =>  clamp squared norms at eps^2 (f32-safe).
    eps2 = jnp.float32(1e-24)
    s_xy = jnp.sum(composed * rep, axis=-1)            # [TB]
    s_xx = jnp.sum(composed * composed, axis=-1)       # [TB]
    s_yy = jnp.sum(rep * rep, axis=-1)                 # [TB]
    inv = (jax.lax.rsqrt(jnp.maximum(s_xx, eps2)) *
           jax.lax.rsqrt(jnp.maximum(s_yy, eps2)))
    dist = jnp.float32(1.0) - s_xy * inv               # [TB]
    out_ref[...] = dist[None, None, :]                 # lane-dense (1, 1, TB)


def _flatten_expr(expr):
    """Flatten the nested-tuple expression into its leaf index arrays.

    Composition is elementwise addition (associative/commutative), so
    compose(expr) == sum of embeddings of all leaves.
    """
    if isinstance(expr, tuple):
        if len(expr) == 1:
            return _flatten_expr(expr[0])
        leaves = []
        for e in expr:
            leaves.extend(_flatten_expr(e))
        return leaves
    return [expr]


def _round_up(x, m):
    return ((x + m - 1) // m) * m


def objective_forward(emb_weight, rep, expr):
    """Pallas equivalent of Objective.forward(rep, expr).

    emb_weight: [V, D] float32 embedding table
    rep:        [B, D] float32
    expr:       nested tuple of int index arrays, each of shape [B]
    returns:    [B] float32 (1 - cosine similarity)
    """
    leaves = _flatten_expr(expr)
    rep = rep.astype(jnp.float32)
    emb_weight = emb_weight.astype(jnp.float32)
    B, D = rep.shape
    L = len(leaves)

    # XLA-side gather (review item 1, option b): only the L needed rows per
    # batch element leave HBM instead of streaming the whole [V, D] table.
    gathered = [jnp.take(emb_weight, jnp.asarray(leaf).astype(jnp.int32), axis=0)
                for leaf in leaves]                     # L x [B, D] float32

    # ---- tile planning -----------------------------------------------------
    try:
        vmem_cap = int(pltpu.get_tpu_info().vmem_capacity_bytes)
    except Exception:
        vmem_cap = 64 << 20                             # v7x-safe fallback

    # Double-buffered (L leaf + 1 rep) input blocks per batch row + tiny output.
    per_row_bytes = 2 * (L + 1) * D * 4 + 8
    tile_budget = max(2 << 20, vmem_cap // 2 - (4 << 20))
    tb_cap = max(8, (tile_budget // per_row_bytes) // 8 * 8)
    TB = int(min(512, tb_cap, _round_up(B, 8)))

    # v7x megacore: prefer >= 2 batch tiles so both TensorCores get work.
    if _round_up(B, 8) // TB < 2 and _round_up(B, 8) >= 16:
        TB = max(8, _round_up(_round_up(B, 8) // 2, 8))

    Bp = _round_up(B, TB)
    nb = Bp // TB

    if Bp != B:
        pad = ((0, Bp - B), (0, 0))
        rep = jnp.pad(rep, pad)                         # zero rows -> dist=1, sliced off
        gathered = [jnp.pad(g, pad) for g in gathered]

    tile_bytes = 2 * (L + 1) * TB * D * 4 + 2 * TB * 4
    vmem_limit = int(min(vmem_cap - (4 << 20),
                         max(32 << 20, tile_bytes + (8 << 20))))

    in_block = pl.BlockSpec((TB, D), lambda i: (i, 0))

    out = pl.pallas_call(
        _objective_kernel,
        out_shape=jax.ShapeDtypeStruct((nb, 1, TB), jnp.float32),
        grid_spec=pltpu.PrefetchScalarGridSpec(
            num_scalar_prefetch=0,
            grid=(nb,),
            in_specs=[in_block] * (L + 1),              # rep + L gathered leaves
            out_specs=pl.BlockSpec((1, 1, TB), lambda i: (i, 0, 0)),
        ),
        compiler_params=pltpu.CompilerParams(
            dimension_semantics=("parallel",),
            vmem_limit_bytes=vmem_limit,
        ),
    )(rep, *gathered)
    return out.reshape(-1)[:B]


if __name__ == "__main__":
    # Small deterministic setup consistent with Objective(vocab, repr_size, zero_init)
    vocab_size = 16          # len(vocab)
    repr_size = 32
    batch = 8
    zero_init = False

    key = jax.random.PRNGKey(0)
    k_emb, k_rep, k_a, k_b, k_c = jax.random.split(key, 5)

    if zero_init:
        emb_weight = jnp.zeros((vocab_size, repr_size), jnp.float32)
    else:
        # nn.Embedding default init ~ N(0, 1); deterministic here.
        emb_weight = jax.random.normal(k_emb, (vocab_size, repr_size), jnp.float32)

    rep = jax.random.normal(k_rep, (batch, repr_size), jnp.float32)

    # expression ((a, b), c)  ->  emb(a) + emb(b) + emb(c)
    a = jax.random.randint(k_a, (batch,), 0, vocab_size, jnp.int32)
    b = jax.random.randint(k_b, (batch,), 0, vocab_size, jnp.int32)
    c = jax.random.randint(k_c, (batch,), 0, vocab_size, jnp.int32)
    expr = ((a, b), c)

    out = objective_forward(emb_weight, rep, expr)
    out = jax.block_until_ready(out)

    # Reference check in plain JAX (same math as the PyTorch module).
    composed_ref = emb_weight[a] + emb_weight[b] + emb_weight[c]
    def _norm(x):
        return x / jnp.maximum(jnp.linalg.norm(x, axis=-1, keepdims=True), 1e-12)
    ref = 1.0 - jnp.sum(_norm(composed_ref) * _norm(rep), axis=-1)
    assert out.shape == (batch,)
    assert jnp.allclose(out, ref, atol=1e-5, rtol=1e-5)

    print("KERNEL_OK")
</pallas_src>

<mosaic_0001>
module attributes {stable_mosaic.version = 11 : i64} {
  func.func @_objective_kernel(%arg0: i32, %arg1: memref<8x32xf32, #tpu.memory_space<vmem>>, %arg2: memref<8x32xf32, #tpu.memory_space<vmem>>, %arg3: memref<8x32xf32, #tpu.memory_space<vmem>>, %arg4: memref<8x32xf32, #tpu.memory_space<vmem>>, %arg5: memref<1x1x8xf32, #tpu.memory_space<vmem>>) attributes {dimension_semantics = [#tpu.dimension_semantics<parallel>], iteration_bounds = array<i64: 1>, scalar_prefetch = 0 : i64, scratch_operands = 0 : i64, tpu.core_type = #tpu.core_type<tc>, window_params = [{transform_indices = @transform_0, window_bounds = array<i64: 8, 32>}, {transform_indices = @transform_1, window_bounds = array<i64: 8, 32>}, {transform_indices = @transform_2, window_bounds = array<i64: 8, 32>}, {transform_indices = @transform_3, window_bounds = array<i64: 8, 32>}, {transform_indices = @transform_4, window_bounds = array<i64: 1, 1, 8>}]} {
    %c0 = arith.constant 0 : index
    %c0_0 = arith.constant 0 : index
    %0 = vector.load %arg2[%c0, %c0_0] : memref<8x32xf32, #tpu.memory_space<vmem>>, vector<8x32xf32>
    %c0_1 = arith.constant 0 : index
    %c0_2 = arith.constant 0 : index
    %1 = vector.load %arg3[%c0_1, %c0_2] : memref<8x32xf32, #tpu.memory_space<vmem>>, vector<8x32xf32>
    %2 = arith.addf %0, %1 : vector<8x32xf32>
    %c0_3 = arith.constant 0 : index
    %c0_4 = arith.constant 0 : index
    %3 = vector.load %arg4[%c0_3, %c0_4] : memref<8x32xf32, #tpu.memory_space<vmem>>, vector<8x32xf32>
    %4 = arith.addf %2, %3 : vector<8x32xf32>
    %c0_5 = arith.constant 0 : index
    %c0_6 = arith.constant 0 : index
    %5 = vector.load %arg1[%c0_5, %c0_6] : memref<8x32xf32, #tpu.memory_space<vmem>>, vector<8x32xf32>
    %6 = arith.mulf %4, %5 : vector<8x32xf32>
    %cst = arith.constant dense<0.000000e+00> : vector<8xf32>
    %7 = vector.multi_reduction <add>, %6, %cst [1] : vector<8x32xf32> to vector<8xf32>
    %8 = arith.mulf %4, %4 : vector<8x32xf32>
    %cst_7 = arith.constant dense<0.000000e+00> : vector<8xf32>
    %9 = vector.multi_reduction <add>, %8, %cst_7 [1] : vector<8x32xf32> to vector<8xf32>
    %10 = arith.mulf %5, %5 : vector<8x32xf32>
    %cst_8 = arith.constant dense<0.000000e+00> : vector<8xf32>
    %11 = vector.multi_reduction <add>, %10, %cst_8 [1] : vector<8x32xf32> to vector<8xf32>
    %cst_9 = arith.constant 1.000000e-24 : f32
    %12 = vector.broadcast %cst_9 : f32 to vector<8xf32>
    %13 = arith.maximumf %9, %12 : vector<8xf32>
    %14 = math.rsqrt %13 : vector<8xf32>
    %cst_10 = arith.constant 1.000000e-24 : f32
    %15 = vector.broadcast %cst_10 : f32 to vector<8xf32>
    %16 = arith.maximumf %11, %15 : vector<8xf32>
    %17 = math.rsqrt %16 : vector<8xf32>
    %18 = arith.mulf %14, %17 : vector<8xf32>
    %19 = arith.mulf %7, %18 : vector<8xf32>
    %cst_11 = arith.constant 1.000000e+00 : f32
    %20 = vector.broadcast %cst_11 : f32 to vector<8xf32>
    %21 = arith.subf %20, %19 : vector<8xf32>
    %22 = vector.shape_cast %21 : vector<8xf32> to vector<1x1x8xf32>
    %c0_12 = arith.constant 0 : index
    %c0_13 = arith.constant 0 : index
    %c0_14 = arith.constant 0 : index
    %23 = vector.load %arg5[%c0_12, %c0_13, %c0_14] : memref<1x1x8xf32, #tpu.memory_space<vmem>>, vector<1x1x8xf32>
    tpu.vector_store %arg5[%c0_12, %c0_13, %c0_14], %22 {strides = array<i32>} : memref<1x1x8xf32, #tpu.memory_space<vmem>>, vector<1x1x8xf32>,
    return
  }
  func.func @transform_0(%arg0: i32) -> (i32, i32) {
    %c0_i32 = arith.constant 0 : i32
    %c0_i32_0 = arith.constant 0 : i32
    return %arg0, %c0_i32 : i32, i32
  }
  func.func @transform_1(%arg0: i32) -> (i32, i32) {
    %c0_i32 = arith.constant 0 : i32
    %c0_i32_0 = arith.constant 0 : i32
    return %arg0, %c0_i32 : i32, i32
  }
  func.func @transform_2(%arg0: i32) -> (i32, i32) {
    %c0_i32 = arith.constant 0 : i32
    %c0_i32_0 = arith.constant 0 : i32
    return %arg0, %c0_i32 : i32, i32
  }
  func.func @transform_3(%arg0: i32) -> (i32, i32) {
    %c0_i32 = arith.constant 0 : i32
    %c0_i32_0 = arith.constant 0 : i32
    return %arg0, %c0_i32 : i32, i32
  }
  func.func @transform_4(%arg0: i32) -> (i32, i32, i32) {
    %c0_i32 = arith.constant 0 : i32
    %c0_i32_0 = arith.constant 0 : i32
    %c0_i32_1 = arith.constant 0 : i32
    return %arg0, %c0_i32, %c0_i32_0 : i32, i32, i32
  }
}

</mosaic_0001>

<bundles_post_ra>
// kernel: tpu_custom_call.1
= control target key start
LH: loop header
LB: loop body
LE: loop exit
PB: predicated region body
PF: predicated region fallthrough
CT: control target
= control target key end

     0   :  { %9 = vsyncpa [#allocation3], 0  ;;  %s325_s0 = inlined_call_operand.hbm [shape: f32[8,32], index: 0, kind: input, shape index: {}]   ;;  %s326_s1 = inlined_call_operand.hbm [shape: f32[8,32], index: 1, kind: input, shape index: {}]   ;;  %s327_s2 = inlined_call_operand.hbm [shape: f32[8,32], index: 2, kind: input, shape index: {}]   ;;  %s328_s3 = inlined_call_operand.hbm [shape: f32[8,32], index: 3, kind: input, shape index: {}]   ;;  %s329_s4 = inlined_call_operand.hbm [shape: f32[1,1,8], index: 4, kind: output, shape index: {}]  }
   0x1   :  { %10 = vsyncpa [#allocation6], 0 }
   0x2   :  { %11 = vsyncpa [#allocation9], 0  ;;  %s29_s17 = sshll.u32 %s326_s1, 4  ;;  %s30_s17 = int_to_ptr.hbm [resolvable:$true] %s29_s17 }
   0x3   :  { %12 = vsyncpa [#allocation4], 0  ;;  %s280_s18 = smov [#allocation5]   ;;  %s18_s22 = sshll.u32 %s325_s0, 4  ;;  %s19_s22 = int_to_ptr.hbm [resolvable:$true] %s18_s22 }
   0x4   :  { %s31_s19 = sshll.u32 %s280_s18, 4  ;;  %s281_s23 = smov [#allocation2]   ;;  %s32_s19 = int_to_ptr.vmem [resolvable:$true] %s31_s19 }
   0x5   :  { %34 = dma.hbm_to_vmem [thread:$0]  %s30_s17, 128, %s32_s19, [#allocation6]  }
   0x6   :  { %s20_s24 = sshll.u32 %s281_s23, 4  ;;  %s40_s27 = sshll.u32 %s327_s2, 4  ;;  %s21_s24 = int_to_ptr.vmem [resolvable:$true] %s20_s24  ;;  %s41_s27 = int_to_ptr.hbm [resolvable:$true] %s40_s27 }
   0x7   :  { %23 = dma.hbm_to_vmem [thread:$0]  %s19_s22, 128, %s21_s24, [#allocation3]  }
   0x8   :  { %s51_s29 = sshll.u32 %s328_s3, 4  ;;  %s282_s30 = smov [#allocation7]   ;;  %s52_s29 = int_to_ptr.hbm [resolvable:$true] %s51_s29 }
   0x9   :  { %s42_s5 = sshll.u32 %s282_s30, 4  ;;  %s283_s0 = smov [#allocation8]   ;;  %s43_s5 = int_to_ptr.vmem [resolvable:$true] %s42_s5 }
   0xa   :  { %45 = dma.hbm_to_vmem [thread:$0]  %s41_s27, 128, %s43_s5, [#allocation6]  }
   0xb   :  { %s53_s6 = sshll.u32 %s283_s0, 4  ;;  %s54_s6 = int_to_ptr.vmem [resolvable:$true] %s53_s6 }
   0xc   :  { %56 = dma.hbm_to_vmem [thread:$0]  %s52_s29, 128, %s54_s6, [#allocation9]  }
   0xd   :  { %272 = dma.done.wait [#allocation3], 128  }
   0xe   :  { %273 = vsyncadd [#allocation3], 4294967168 }
   0xf   :  { %274 = dma.done.wait [#allocation6], 256  }
  0x10   :  { %275 = vsyncadd [#allocation6], 4294967040 }
  0x11   :  { %276 = dma.done.wait [#allocation9], 128  }
  0x12   :  { %277 = vsyncadd [#allocation9], 4294967168  ;;  %v73_v0 = vld [vmem:[#allocation5] sm:$0xff]  ;;  %v74_v1 = vld [vmem:[#allocation7] sm:$0xff]  ;;  %vm80_vm0 = vcmask 261120   ;;  %v118_v28 = vlaneseq  ;;  %s284_s2 = smov [#allocation10]  }
  0x13   :  { %v76_v2 = vld [vmem:[#allocation8] sm:$0xff]  ;;  %v75_v3 = vadd.f32 %v74_v1, %v73_v0  ;;  %v78_v5 = vld [vmem:[#allocation2] sm:$0xff]  ;;  %s129_s3 = sshll.u32 %s284_s2, 4  ;;  %s131_s9 = sshll.u32 %s329_s4, 4  ;;  %vm122_vm7 = vcmask 57344   ;;  %s130_s3 = int_to_ptr.vmem [resolvable:$true] %s129_s3  ;;  %s132_s9 = int_to_ptr.hbm [resolvable:$true] %s131_s9 }
  0x14   :  { %v88_v10 = vmul.f32 %v78_v5, %v78_v5  ;;  %v119_v33 = vand.u32 127, %v118_v28 }
  0x15   :  { %v77_v4 = vadd.f32 %v76_v2, %v75_v3 }
  0x16   :  { %v89_v11 = vsel %vm80_vm0, %v88_v10, 0.0 }
  0x17   :  { %v84_v6 = vmul.f32 %v77_v4, %v77_v4  ;;  %v79_v7 = vmul.f32 %v78_v5, %v77_v4 }
  0x19   :  { %v85_v8 = vsel %vm80_vm0, %v84_v6, 0.0  ;;  %v81_v9 = vsel %vm80_vm0, %v79_v7, 0.0 }
  0x1a   :  { %86 = vadd.xlane.f32.xlu0 %v85_v8  ;;  %82 = vadd.xlane.f32.xlu1 %v81_v9 }
  0x22   :  { %90 = vadd.xlane.f32.xlu0 %v89_v11 }
  0x8d   :  { %v87_v12 = vpop.xlane.xlu0 %86  ;;  %v83_v31 = vpop.xlane.xlu1 %82 }
  0x8e   :  { %v92_v13 = vmax.f32 %v87_v12, 1e-24 }
  0x90   :  { %148 = vrsqrt.f32 %v92_v13  ;;  %vm99_vm3 = vweird.f32 %v92_v13 }
  0x95   :  { %v91_v14 = vpop.xlane.xlu0 %90 }
  0x96   :  { %v149_v15 = vpop.eup %148  ;;  %v103_v16 = vmax.f32 %v91_v14, 1e-24 }
  0x97   :  { %v94_v17 = vmul.f32 %v149_v15, %v92_v13  ;;  %vm100_vm1 = vweird.f32 %v149_v15 }
  0x98   :  { %150 = vrsqrt.f32 %v103_v16  ;;  %vm110_vm4 = vweird.f32 %v103_v16  ;;  %vm101_vm5 = vmor %vm99_vm3, %vm100_vm1 }
  0x99   :  { %v95_v18 = vmul.f32 %v149_v15, %v94_v17 }
  0x9b   :  { %v96_v19 = vmul.f32 0.5, %v95_v18 }
  0x9d   :  { %v97_v22 = vsub.f32 1.5, %v96_v19 }
  0x9e   :  { %v151_v20 = vpop.eup %150 }
  0x9f   :  { %v105_v21 = vmul.f32 %v151_v20, %v103_v16  ;;  %vm111_vm2 = vweird.f32 %v151_v20  ;;  %v98_v26 = vmul.f32 %v149_v15, %v97_v22 }
  0xa0   :  { %vm112_vm6 = vmor %vm110_vm4, %vm111_vm2 }
  0xa1   :  { %v106_v23 = vmul.f32 %v151_v20, %v105_v21  ;;  %v102_v29 = vsel %vm101_vm5, %v149_v15, %v98_v26 }
  0xa3   :  { %v107_v24 = vmul.f32 0.5, %v106_v23 }
  0xa5   :  { %v108_v25 = vsub.f32 1.5, %v107_v24 }
  0xa7   :  { %v109_v27 = vmul.f32 %v151_v20, %v108_v25 }
  0xa9   :  { %v113_v30 = vsel %vm112_vm6, %v151_v20, %v109_v27 }
  0xaa   :  { %v114_v32 = vmul.f32 %v113_v30, %v102_v29 }
  0xac   :  { %v115_v34 = vmul.f32 %v114_v32, %v83_v31 }
  0xae   :  { %v116_v35 = vsub.f32 1.0, %v115_v34 }
  0xb0   :  { %v120_v36 = vperm.slane %v116_v35, %v119_v33 }
  0xb2   :  { %123 = vst.msk [vmem:[#allocation10] sm:$0x1] %vm122_vm7, %v120_v36 }
  0xb3   :  { %134 = dma.vmem_to_hbm [thread:$0]  %s130_s3, 16, %s132_s9, [#allocation4]  }
  0xb4   :  { %278 = dma.done.wait [#allocation4], 16  }
  0xb5   :  { %279 = vsyncadd [#allocation4], 4294967280 }
  0xb6   :  { %139 = vsyncpa [#allocation3], 1 }
  0xb7   :  { %140 = vsyncpa [#allocation6], 1 }
  0xb8   :  { %141 = vsyncpa [#allocation9], 1 }
  0xb9   :  { %142 = vsyncpa [#allocation4], 1 }

</bundles_post_ra>
